<compile_context>
chip_gen: v7x
topology: tpu7x:2x2x1
jax: 0.10.0
libtpu: 0.0.40
codegen_flags: <defaults>
</compile_context>

<pallas_src>
import functools
import math

import jax
import jax.numpy as jnp
from jax import lax
from jax.experimental import pallas as pl
from jax.experimental.pallas import tpu as pltpu


# ---------------------------------------------------------------------------
# MXU path: SimCSE-style outer-product broadcast  x:[M,1,H] vs y:[1,N,H]
#   out[i, j] = (x_i . y_j) / max(||x_i|| * ||y_j||, eps) / t
# Tiled (i, j, k) matmul with an f32 VMEM accumulator; only O((M+N)*H) bytes of
# input traffic instead of the O(M*N*H) materialized broadcast.
# ---------------------------------------------------------------------------
def _cos_matmul_kernel(x_ref, y_ref, nx_ref, ny_ref, o_ref, acc_ref, *, inv_t, eps):
    k = pl.program_id(2)

    @pl.when(k == 0)
    def _():
        acc_ref[...] = jnp.zeros_like(acc_ref)

    # (tm, tk) . (tn, tk)^T -> (tm, tn) on the MXU, f32 accumulation.
    acc_ref[...] += lax.dot_general(
        x_ref[...],
        y_ref[...],
        dimension_numbers=(((1,), (1,)), ((), ())),
        preferred_element_type=jnp.float32,
        precision=lax.Precision.HIGHEST,
    )

    @pl.when(k == pl.num_programs(2) - 1)
    def _():
        nx = nx_ref[...].astype(jnp.float32)   # (tm, 1)  squared row norms of x
        ny = ny_ref[...].astype(jnp.float32)   # (1, tn)  squared row norms of y
        # cos = dot / max(sqrt(nx*ny), eps)  ==  dot * rsqrt(max(nx*ny, eps^2))
        # (sqrt is monotone, so semantics are identical; rsqrt goes to the EUP).
        inv_denom = lax.rsqrt(jnp.maximum(nx * ny, eps * eps))
        o_ref[...] = (acc_ref[...] * inv_denom * inv_t).astype(o_ref.dtype)


def _pick_reduction_tile(h):
    for cand in (512, 256, 128):
        if h >= cand and h % cand == 0:
            return cand
    return h  # full H (H < 128 or not 128-aligned): no ragged reduction blocks


def _cosine_matmul(xm, yn, t, *, eps, out_dtype):
    m, h = xm.shape
    n, _ = yn.shape

    # Per-row squared norms: O((M+N)*H) wrapper glue; the O(M*N*H) work is the
    # Pallas matmul below.
    xf = xm.astype(jnp.float32)
    yf = yn.astype(jnp.float32)
    nx = jnp.sum(xf * xf, axis=-1, keepdims=True)   # [M, 1]
    ny = jnp.sum(yf * yf, axis=-1)[None, :]         # [1, N]

    tm = m if m <= 256 else 256                     # 256-aligned for v6e/v7x MXU
    tn = n if n <= 256 else 256                     # multiple of 128 -> lane-dense out
    tk = _pick_reduction_tile(h)

    kernel = functools.partial(_cos_matmul_kernel, inv_t=1.0 / float(t), eps=float(eps))
    out = pl.pallas_call(
        kernel,
        out_shape=jax.ShapeDtypeStruct((m, n), out_dtype),
        grid_spec=pltpu.PrefetchScalarGridSpec(
            num_scalar_prefetch=0,
            grid=(pl.cdiv(m, tm), pl.cdiv(n, tn), pl.cdiv(h, tk)),
            in_specs=[
                pl.BlockSpec((tm, tk), lambda i, j, k: (i, k)),
                pl.BlockSpec((tn, tk), lambda i, j, k: (j, k)),
                pl.BlockSpec((tm, 1), lambda i, j, k: (i, 0)),
                pl.BlockSpec((1, tn), lambda i, j, k: (0, j)),
            ],
            out_specs=pl.BlockSpec((tm, tn), lambda i, j, k: (i, j)),
            scratch_shapes=[pltpu.VMEM((tm, tn), jnp.float32)],
        ),
        compiler_params=pltpu.CompilerParams(
            # i/j parallel -> shards across the 2 TensorCores on v7x; k is the
            # reduction carried in the VMEM accumulator.
            dimension_semantics=("parallel", "parallel", "arbitrary"),
        ),
    )(xm, yn, nx, ny)
    return out


# ---------------------------------------------------------------------------
# Generic broadcast fallback: row-wise cosine over the last dim.
# ---------------------------------------------------------------------------
def _cos_rowwise_kernel(x_ref, y_ref, o_ref, *, inv_t, eps):
    x = x_ref[...].astype(jnp.float32)
    y = y_ref[...].astype(jnp.float32)
    dot = jnp.sum(x * y, axis=-1, keepdims=True)    # (tm, 1)
    nx = jnp.sum(x * x, axis=-1, keepdims=True)
    ny = jnp.sum(y * y, axis=-1, keepdims=True)
    # EUP rsqrt instead of sqrt + divide (identical math, free VLIW slot).
    inv_denom = lax.rsqrt(jnp.maximum(nx * ny, eps * eps))
    o_ref[...] = (dot * inv_denom * inv_t).astype(o_ref.dtype)


def _cosine_rowwise(x, y, t, *, eps, out_dtype):
    bshape = jnp.broadcast_shapes(x.shape, y.shape)
    *lead, h = bshape
    m = int(math.prod(lead)) if lead else 1
    xf = jnp.broadcast_to(x, bshape).reshape(m, h)
    yf = jnp.broadcast_to(y, bshape).reshape(m, h)

    # Largest row tile (multiple of 8, capped at 1024) keeping
    # 2 inputs x 2 pipeline buffers of (tm, H) f32 under ~16 MiB — safe across
    # v5e / v6e / v7x scoped-VMEM limits (explicitly raised to 32 MiB below).
    tm = max(8, min(1024, (1 << 20) // max(h, 1)))
    tm -= tm % 8
    tm = max(tm, 8)
    if tm >= m:
        tm = m
    # TODO(synk): tile the H (reduction) axis for extremely large H where even
    #             an (8, H) f32 tile does not fit in VMEM.

    kernel = functools.partial(_cos_rowwise_kernel, inv_t=1.0 / float(t), eps=float(eps))
    out = pl.pallas_call(
        kernel,
        out_shape=jax.ShapeDtypeStruct((m, 1), out_dtype),
        grid_spec=pltpu.PrefetchScalarGridSpec(
            num_scalar_prefetch=0,
            grid=(pl.cdiv(m, tm),),          # ragged last block; no jnp.pad pass
            in_specs=[
                pl.BlockSpec((tm, h), lambda i: (i, 0)),
                pl.BlockSpec((tm, h), lambda i: (i, 0)),
            ],
            out_specs=pl.BlockSpec((tm, 1), lambda i: (i, 0)),
        ),
        compiler_params=pltpu.CompilerParams(
            dimension_semantics=("parallel",),
            vmem_limit_bytes=32 * 1024 * 1024,
        ),
    )(xf, yf)
    return out[:, 0].reshape(tuple(lead))


# ---------------------------------------------------------------------------
# Public entry point: Similarity.forward(x, y) = cosine_similarity(x, y, -1) / t
# ---------------------------------------------------------------------------
def similarity(x, y, t, *, eps=1e-8):
    x = jnp.asarray(x)
    y = jnp.asarray(y)
    out_dtype = jnp.result_type(x.dtype, y.dtype)

    # SimCSE-style outer-product broadcast -> MXU matmul path.
    if x.ndim == 3 and y.ndim == 3 and x.shape[-1] == y.shape[-1]:
        if x.shape[1] == 1 and y.shape[0] == 1:
            return _cosine_matmul(x[:, 0, :], y[0, :, :], t, eps=eps, out_dtype=out_dtype)
        if x.shape[0] == 1 and y.shape[1] == 1:
            return _cosine_matmul(y[:, 0, :], x[0, :, :], t, eps=eps, out_dtype=out_dtype)

    # Anything else: generic broadcast, row-wise reduction kernel.
    return _cosine_rowwise(x, y, t, eps=eps, out_dtype=out_dtype)


if __name__ == "__main__":
    key = jax.random.PRNGKey(0)
    k1, k2, k3, k4 = jax.random.split(key, 4)
    B, H = 8, 32
    t = 0.05

    # --- MXU (SimCSE) path: x [B,1,H] vs y [1,B,H] -> [B, B] -----------------
    x = jax.random.normal(k1, (B, 1, H), dtype=jnp.float32)
    y = jax.random.normal(k2, (1, B, H), dtype=jnp.float32)
    out = jax.block_until_ready(similarity(x, y, t))

    xb = jnp.broadcast_to(x, (B, B, H))
    yb = jnp.broadcast_to(y, (B, B, H))
    dot = jnp.sum(xb * yb, axis=-1)
    denom = jnp.maximum(
        jnp.sqrt(jnp.sum(xb * xb, axis=-1) * jnp.sum(yb * yb, axis=-1)), 1e-8
    )
    ref = dot / denom / t
    assert out.shape == (B, B)
    assert jnp.allclose(out, ref, atol=5e-4, rtol=5e-4)

    # --- Row-wise fallback path: same-shape elementwise broadcast ------------
    x2 = jax.random.normal(k3, (4, 6, H), dtype=jnp.float32)
    y2 = jax.random.normal(k4, (4, 6, H), dtype=jnp.float32)
    out2 = jax.block_until_ready(similarity(x2, y2, t))

    dot2 = jnp.sum(x2 * y2, axis=-1)
    denom2 = jnp.maximum(
        jnp.sqrt(jnp.sum(x2 * x2, axis=-1) * jnp.sum(y2 * y2, axis=-1)), 1e-8
    )
    ref2 = dot2 / denom2 / t
    assert out2.shape == (4, 6)
    assert jnp.allclose(out2, ref2, atol=1e-4, rtol=1e-4)

    print("KERNEL_OK")
</pallas_src>

<mosaic_0001>
module attributes {stable_mosaic.version = 11 : i64} {
  func.func @_cos_matmul_kernel(%arg0: i32, %arg1: i32, %arg2: i32, %arg3: memref<8x32xf32, #tpu.memory_space<vmem>>, %arg4: memref<8x32xf32, #tpu.memory_space<vmem>>, %arg5: memref<8x1xf32, #tpu.memory_space<vmem>>, %arg6: memref<1x8xf32, #tpu.memory_space<vmem>>, %arg7: memref<8x8xf32, #tpu.memory_space<vmem>>, %arg8: memref<8x8xf32, #tpu.memory_space<vmem>>) attributes {dimension_semantics = [#tpu.dimension_semantics<parallel>, #tpu.dimension_semantics<parallel>, #tpu.dimension_semantics<arbitrary>], iteration_bounds = array<i64: 1, 1, 1>, scalar_prefetch = 0 : i64, scratch_operands = 1 : i64, tpu.core_type = #tpu.core_type<tc>, window_params = [{transform_indices = @transform_0, window_bounds = array<i64: 8, 32>}, {transform_indices = @transform_1, window_bounds = array<i64: 8, 32>}, {transform_indices = @transform_2, window_bounds = array<i64: 8, 1>}, {transform_indices = @transform_3, window_bounds = array<i64: 1, 8>}, {transform_indices = @transform_4, window_bounds = array<i64: 8, 8>}]} {
    %c0_i32 = arith.constant 0 : i32
    %0 = arith.cmpi eq, %arg2, %c0_i32 : i32
    %1 = arith.extui %0 : i1 to i32
    %c0_i32_0 = arith.constant 0 : i32
    %2 = arith.cmpi ne, %1, %c0_i32_0 : i32
    scf.if %2 {
      %cst_10 = arith.constant 0.000000e+00 : f32
      %12 = vector.broadcast %cst_10 : f32 to vector<8x8xf32>
      %c0_11 = arith.constant 0 : index
      %c0_12 = arith.constant 0 : index
      %13 = vector.load %arg8[%c0_11, %c0_12] : memref<8x8xf32, #tpu.memory_space<vmem>>, vector<8x8xf32>
      tpu.vector_store %arg8[%c0_11, %c0_12], %12 {strides = array<i32>} : memref<8x8xf32, #tpu.memory_space<vmem>>, vector<8x8xf32>,
    } else {
    }
    %c0 = arith.constant 0 : index
    %c0_1 = arith.constant 0 : index
    %3 = vector.load %arg8[%c0, %c0_1] : memref<8x8xf32, #tpu.memory_space<vmem>>, vector<8x8xf32>
    %c0_2 = arith.constant 0 : index
    %c0_3 = arith.constant 0 : index
    %4 = vector.load %arg3[%c0_2, %c0_3] : memref<8x32xf32, #tpu.memory_space<vmem>>, vector<8x32xf32>
    %c0_4 = arith.constant 0 : index
    %c0_5 = arith.constant 0 : index
    %5 = vector.load %arg4[%c0_4, %c0_5] : memref<8x32xf32, #tpu.memory_space<vmem>>, vector<8x32xf32>
    %cst = arith.constant dense<0.000000e+00> : vector<8x8xf32>
    %6 = tpu.matmul %4, %5, %cst {dimension_numbers = #tpu.dot_dimension_numbers<[1], [1], [0], [0], [0, 0, 1, 0], [], []>, precision = #tpu.contract_precision<fp32>} : vector<8x32xf32>, vector<8x32xf32>, vector<8x8xf32> -> vector<8x8xf32>
    %7 = arith.addf %3, %6 : vector<8x8xf32>
    %c0_6 = arith.constant 0 : index
    %c0_7 = arith.constant 0 : index
    %8 = vector.load %arg8[%c0_6, %c0_7] : memref<8x8xf32, #tpu.memory_space<vmem>>, vector<8x8xf32>
    tpu.vector_store %arg8[%c0_6, %c0_7], %7 {strides = array<i32>} : memref<8x8xf32, #tpu.memory_space<vmem>>, vector<8x8xf32>,
    %c0_i32_8 = arith.constant 0 : i32
    %9 = arith.cmpi eq, %arg2, %c0_i32_8 : i32
    %10 = arith.extui %9 : i1 to i32
    %c0_i32_9 = arith.constant 0 : i32
    %11 = arith.cmpi ne, %10, %c0_i32_9 : i32
    scf.if %11 {
      %c0_10 = arith.constant 0 : index
      %c0_11 = arith.constant 0 : index
      %12 = vector.load %arg5[%c0_10, %c0_11] : memref<8x1xf32, #tpu.memory_space<vmem>>, vector<8x1xf32>
      %c0_12 = arith.constant 0 : index
      %c0_13 = arith.constant 0 : index
      %13 = vector.load %arg6[%c0_12, %c0_13] : memref<1x8xf32, #tpu.memory_space<vmem>>, vector<1x8xf32>
      %14 = vector.broadcast %12 : vector<8x1xf32> to vector<8x8xf32>
      %15 = vector.broadcast %13 : vector<1x8xf32> to vector<8x8xf32>
      %16 = arith.mulf %14, %15 : vector<8x8xf32>
      %cst_14 = arith.constant 1.000000e-16 : f32
      %17 = vector.broadcast %cst_14 : f32 to vector<8x8xf32>
      %18 = arith.maximumf %16, %17 : vector<8x8xf32>
      %19 = math.rsqrt %18 : vector<8x8xf32>
      %c0_15 = arith.constant 0 : index
      %c0_16 = arith.constant 0 : index
      %20 = vector.load %arg8[%c0_15, %c0_16] : memref<8x8xf32, #tpu.memory_space<vmem>>, vector<8x8xf32>
      %21 = arith.mulf %20, %19 : vector<8x8xf32>
      %cst_17 = arith.constant 2.000000e+01 : f32
      %22 = vector.broadcast %cst_17 : f32 to vector<8x8xf32>
      %23 = arith.mulf %21, %22 : vector<8x8xf32>
      %c0_18 = arith.constant 0 : index
      %c0_19 = arith.constant 0 : index
      %24 = vector.load %arg7[%c0_18, %c0_19] : memref<8x8xf32, #tpu.memory_space<vmem>>, vector<8x8xf32>
      tpu.vector_store %arg7[%c0_18, %c0_19], %23 {strides = array<i32>} : memref<8x8xf32, #tpu.memory_space<vmem>>, vector<8x8xf32>,
    } else {
    }
    return
  }
  func.func @transform_0(%arg0: i32, %arg1: i32, %arg2: i32) -> (i32, i32) {
    %c0_i32 = arith.constant 0 : i32
    return %arg0, %arg2 : i32, i32
  }
  func.func @transform_1(%arg0: i32, %arg1: i32, %arg2: i32) -> (i32, i32) {
    %c0_i32 = arith.constant 0 : i32
    return %arg1, %arg2 : i32, i32
  }
  func.func @transform_2(%arg0: i32, %arg1: i32, %arg2: i32) -> (i32, i32) {
    %c0_i32 = arith.constant 0 : i32
    %c0_i32_0 = arith.constant 0 : i32
    return %arg0, %c0_i32 : i32, i32
  }
  func.func @transform_3(%arg0: i32, %arg1: i32, %arg2: i32) -> (i32, i32) {
    %c0_i32 = arith.constant 0 : i32
    %c0_i32_0 = arith.constant 0 : i32
    return %c0_i32, %arg1 : i32, i32
  }
  func.func @transform_4(%arg0: i32, %arg1: i32, %arg2: i32) -> (i32, i32) {
    %c0_i32 = arith.constant 0 : i32
    return %arg0, %arg1 : i32, i32
  }
}

</mosaic_0001>

<bundles_post_ra>
// kernel: tpu_custom_call.1
= control target key start
LH: loop header
LB: loop body
LE: loop exit
PB: predicated region body
PF: predicated region fallthrough
CT: control target
= control target key end

     0   :  { %9 = vsyncpa [#allocation4], 0  ;;  %s704_s0 = inlined_call_operand.vmem [shape: f32[8,32], index: 0, kind: input, shape index: {}]   ;;  %s705_s1 = inlined_call_operand.hbm [shape: f32[8,32], index: 1, kind: input, shape index: {}]   ;;  %s706_s2 = inlined_call_operand.vmem [shape: f32[8,1], index: 2, kind: input, shape index: {}]   ;;  %s707_s3 = inlined_call_operand.vmem [shape: f32[1,8], index: 3, kind: input, shape index: {}]   ;;  %s708_s4 = inlined_call_operand.hbm [shape: f32[8,8], index: 4, kind: output, shape index: {}]  }
   0x1   :  { %10 = vsyncpa [#allocation5], 0  ;;  %s632_s15 = smov [#allocation3]   ;;  %s584_s19 = scalar_lea.hbm %s705_s1, 128 }
   0x2   :  { %s19_s16 = sshll.u32 %s632_s15, 4  ;;  %p585_p0 = scmp.ne.s32.totalorder %s705_s1, %s584_s19  ;;  %s20_s16 = int_to_ptr.vmem [resolvable:$true] %s19_s16 }
   0x3   :  { %p588_p1 = scmp.lt.u32.totalorder %s584_s19, %s705_s1 }
   0x5   :  { %p590_p2 = pnand %p588_p1, %p585_p0 }
   0x7   :  { %593 = shalt.err (!%p590_p2)
}
   0x8   :  { %s594_s24 = scalar_lea.vmem %s20_s16, 128  ;;  %p599_p4 = scmp.lt.s32.totalorder %s20_s16, %s20_s16 }
   0x9   :  { %p595_p3 = scmp.ne.s32.totalorder %s20_s16, %s594_s24  ;;  %p600_p5 = scmp.lt.s32.totalorder %s594_s24, %s594_s24 }
   0xb   :  { %p601_p6 = por %p600_p5, %p599_p4 }
   0xd   :  { %p602_p7 = pnand %p601_p6, %p595_p3 }
   0xf   :  { %605 = shalt.err (!%p602_p7)
}
  0x10   :  { %22 = dma.hbm_to_vmem [thread:$0]  %s705_s1, 128, %s20_s16, [#allocation4]  }
  0x11   :  { %628 = dma.done.wait [#allocation4], 128  }
  0x12   :  { %629 = vsyncadd [#allocation4], 4294967168  ;;  %v633_v0 = vmov 0.0   ;;  %vm634_vm0 = vmmov 0   ;;  %v635_v1 = vmov 0   ;;  %vm39_vm1 = vcmask 261120  }
  0x13   :  { %546 = vmatprep.subr.mxu0 %v633_v0  ;;  %551 = vmatprep.subr.mxu1 %v633_v0  ;;  %v38_v2 = vld [vmem:[#allocation3] sm:$0xff]  ;;  %v37_v3 = vld [vmem:[%s704_s0] sm:$0xff]  ;;  %vm34_vm2 = vcmask 64512  }
  0x14   :  { %548 = vmatprep.mubr.msk.f32.mxu0 %vm634_vm0, %v633_v0  ;;  %553 = vmatprep.mubr.msk.f32.mxu1 %vm634_vm0, %v633_v0  ;;  %v498_v4 = vld [vmem:[%s706_s2] sm:$0xff]  ;;  %v44_v5 = vsel %vm39_vm1, %v38_v2, 0  ;;  %v41_v6 = vsel %vm39_vm1, %v37_v3, 0  ;;  %35 = vst.msk [vmem:[#allocation2] sm:$0xff] %vm34_vm2, %v633_v0 }
  0x15   :  { %581 = vset.pattern.permute.xlu0 %v635_v1  ;;  %v47_v7 = vand.u32 4294901760, %v44_v5  ;;  %v112_v8 = vand.u32 4294901760, %v41_v6  ;;  %v533_v18 = vld [vmem:[%s707_s3] ss:$0 sm:$0xff]  ;;  %s636_s3 = smov [#allocation6]  }
  0x16   :  { %502 = vperm.xlu0 %581, %v498_v4   ;;  %s524_s30 = sshll.u32 %s636_s3, 4  ;;  %s525_s30 = int_to_ptr.vmem [resolvable:$true] %s524_s30 }
  0x17   :  { %547 = vmatpush3.xpose.msra.mxu0 %v47_v7  ;;  %v124_v9 = vsub.f32 %v44_v5, %v47_v7  ;;  %v113_v10 = vsub.f32 %v41_v6, %v112_v8  ;;  %s606_s5 = scalar_lea.vmem %s525_s30, 128  ;;  %p611_p9 = scmp.lt.s32.totalorder %s525_s30, %s525_s30 }
  0x18   :  { %556 = vmatprep.subr.mxu0 %v633_v0  ;;  %p607_p8 = scmp.ne.s32.totalorder %s525_s30, %s606_s5  ;;  %p612_p10 = scmp.lt.s32.totalorder %s606_s5, %s606_s5 }
  0x19   :  { %v125_v11 = vand.u32 4294901760, %v124_v9  ;;  %v114_v12 = vand.u32 4294901760, %v113_v10 }
  0x1a   :  { %p613_p11 = por %p612_p10, %p611_p9 }
  0x1b   :  { %v126_v13 = vsub.f32 %v124_v9, %v125_v11  ;;  %v115_v14 = vsub.f32 %v113_v10, %v114_v12  ;;  %v36_v35 = vld [vmem:[#allocation2] sm:$0xff] }
  0x1c   :  { %p614_p12 = pnand %p613_p11, %p607_p8 }
  0x1d   :  { %v127_v15 = vand.u32 4294901760, %v126_v13  ;;  %v116_v16 = vand.u32 4294901760, %v115_v14 }
  0x1f   :  { %552 = vmatpush3.xpose.msra.mxu1 %v127_v15  ;;  %549 = vmatmul.mubr.f32.vlgmr.msra.gmra.mrb[0].mxu0 %v116_v16 }
  0x20   :  { %557 = vmatpush3.xpose.msra.mxu0 %v124_v9  ;;  %561 = vmatprep.subr.mxu1 %v633_v0 }
  0x21   :  { %558 = vmatprep.mubr.msk.f32.mxu0 %vm634_vm0, %v633_v0  ;;  %566 = vmatprep.subr.mxu0 %v633_v0 }
  0x22   :  { %554 = vmatmul.mubr.f32.vlgmr.msra.gmra.mrb[0].mxu1 %v112_v8 }
  0x23   :  { %562 = vmatpush3.xpose.msra.mxu1 %v47_v7  ;;  %559 = vmatmul.mubr.f32.vlgmr.msra.gmra.mrb[2].mxu0 %v113_v10 }
  0x24   :  { %563 = vmatprep.mubr.msk.f32.mxu1 %vm634_vm0, %v633_v0  ;;  %567 = vmatpush3.xpose.msra.mxu0 %v125_v11 }
  0x25   :  { %571 = vmatprep.subr.mxu1 %v633_v0  ;;  %568 = vmatprep.mubr.msk.f32.mxu0 %vm634_vm0, %v633_v0 }
  0x26   :  { %564 = vmatmul.mubr.f32.vlgmr.msra.gmra.mrb[2].mxu1 %v114_v12 }
  0x27   :  { %572 = vmatpush3.xpose.msra.mxu1 %v47_v7  ;;  %569 = vmatmul.mubr.f32.vlgmr.msra.gmra.mrb[4].mxu0 %v112_v8 }
  0x28   :  { %573 = vmatprep.mubr.msk.f32.mxu1 %vm634_vm0, %v633_v0 }
  0x2a   :  { %574 = vmatmul.mubr.f32.vlgmr.msra.gmra.mrb[4].mxu1 %v112_v8 }
  0x95   :  { %v503_v19 = vpop.permute.xlu0 %502 }
  0x96   :  { %v511_v22 = vmul.f32 %v533_v18, %v503_v19 }
  0x98   :  { %v512_v29 = vmax.f32 %v511_v22, 1e-16 }
  0x9a   :  { %582 = vrsqrt.f32 %v512_v29 }
  0xa4   :  { %v583_v40 = vpop.eup %582 }
  0xf2   :  { %v118_v17 = vpop.f32.mrb[0].mxu0 }
  0xf3   :  { %v550_v20 = vpop.f32.mrb[1].mxu0 }
  0xf5   :  { %v194_v21 = vpop.f32.mrb[0].mxu1 }
  0xf6   :  { %v195_v23 = vadd.f32 %v194_v21, %v118_v17  ;;  %v555_v24 = vpop.f32.mrb[1].mxu1  ;;  %v268_v25 = vpop.f32.mrb[2].mxu0 }
  0xf7   :  { %v560_v26 = vpop.f32.mrb[3].mxu0 }
  0xf8   :  { %v269_v27 = vadd.f32 %v268_v25, %v195_v23 }
  0xf9   :  { %v342_v28 = vpop.f32.mrb[2].mxu1 }
  0xfa   :  { %v343_v30 = vadd.f32 %v342_v28, %v269_v27  ;;  %v565_v31 = vpop.f32.mrb[3].mxu1  ;;  %v416_v32 = vpop.f32.mrb[4].mxu0 }
  0xfb   :  { %v570_v33 = vpop.f32.mrb[5].mxu0 }
  0xfc   :  { %v417_v34 = vadd.f32 %v416_v32, %v343_v30 }
  0xfd   :  { %v488_v36 = vpop.f32.mrb[4].mxu1 }
  0xfe   :  { %v489_v37 = vadd.f32 %v488_v36, %v417_v34  ;;  %v575_v38 = vpop.f32.mrb[5].mxu1 }
 0x100   :  { %v492_v39 = vadd.f32 %v489_v37, %v36_v35 }
 0x102   :  { %494 = vst.msk [vmem:[#allocation2] sm:$0xff] %vm34_vm2, %v492_v39 }
 0x109   :  { %v514_v41 = vld [vmem:[#allocation2] sm:$0xff] }
 0x10a   :  { %v515_v42 = vmul.f32 %v583_v40, %v514_v41 }
 0x10c   :  { %v516_v43 = vmul.f32 20.0, %v515_v42 }
 0x10e   :  { %517 = vst.msk [vmem:[#allocation6] sm:$0xff] %vm34_vm2, %v516_v43 }
 0x10f   :  { %617 = shalt.err (!%p614_p12)
}
 0x110   :  { %s618_s8 = scalar_lea.hbm %s708_s4, 128 }
 0x111   :  { %p619_p13 = scmp.ne.s32.totalorder %s708_s4, %s618_s8  ;;  %p622_p0 = scmp.lt.u32.totalorder %s618_s8, %s708_s4 }
 0x113   :  { %p624_p1 = pnand %p622_p0, %p619_p13 }
 0x115   :  { %627 = shalt.err (!%p624_p1)
}
 0x116   :  { %527 = dma.vmem_to_hbm [thread:$0]  %s525_s30, 128, %s708_s4, [#allocation5]  }
 0x117   :  { %630 = dma.done.wait [#allocation5], 128  }
 0x118   :  { %631 = vsyncadd [#allocation5], 4294967168 }
 0x119   :  { %531 = vsyncpa [#allocation4], 1 }
 0x11a   :  { %532 = vsyncpa [#allocation5], 1 }

</bundles_post_ra>
